<compile_context>
chip_gen: v7x
topology: tpu7x:2x2x1
jax: 0.10.0
libtpu: 0.0.40
codegen_flags: <defaults>
</compile_context>

<pallas_src>
import functools
import math

import jax
import jax.numpy as jnp
from jax.experimental import pallas as pl
from jax.experimental.pallas import tpu as pltpu


_SQRT_2_OVER_PI = math.sqrt(2.0 / math.pi)


def _gelu_tanh(x):
    # Exact match of the PyTorch `gelu` helper (tanh approximation), in f32.
    return 0.5 * x * (1.0 + jnp.tanh(_SQRT_2_OVER_PI * (x + 0.044715 * (x * x * x))))


def mlp_kernel(x_ref, w1_ref, b1_ref, w2_ref, b2_ref, o_ref, acc_ref):
    # x_ref:  (tm, nx)      f32   (cast to bf16 in-kernel)
    # w1_ref: (nx, tk)      bf16,  b1_ref: (1, tk) f32
    # w2_ref: (tk, nx)      bf16,  b2_ref: (1, nx) f32
    # o_ref:  (tm, nx)      x.dtype
    # acc_ref:(tm, nx)      f32 scratch accumulator over the n_state (k) axis
    k = pl.program_id(1)

    @pl.when(k == 0)
    def _():
        acc_ref[...] = jnp.zeros_like(acc_ref)

    x = x_ref[...].astype(w1_ref.dtype)            # f32 -> bf16 on the VPU
    h = jnp.dot(x, w1_ref[...], preferred_element_type=jnp.float32)
    h = _gelu_tanh(h + b1_ref[...])                # f32 bias-add + gelu
    acc_ref[...] += jnp.dot(h.astype(w2_ref.dtype), w2_ref[...],
                            preferred_element_type=jnp.float32)

    @pl.when(k == pl.num_programs(1) - 1)
    def _():
        # dropout (resid_pdrop) is identity in eval mode.
        o_ref[...] = (acc_ref[...] + b2_ref[...]).astype(o_ref.dtype)


def _round_up(n, m):
    return ((n + m - 1) // m) * m


def _vmem_capacity_bytes():
    try:
        return int(pltpu.get_tpu_info().vmem_capacity_bytes)
    except Exception:
        return 64 * 2 ** 20      # conservative: v7x per-TensorCore VMEM


@functools.lru_cache(maxsize=1)
def _single_buffer_ok():
    """One-time cached AOT probe: does this jax accept pipeline_mode=pl.Buffered(1)?"""
    if not hasattr(pl, "Buffered"):
        return False
    try:
        def _k(a_ref, b_ref, o_ref):
            o_ref[...] = a_ref[...] + b_ref[...]

        f = pl.pallas_call(
            _k,
            out_shape=jax.ShapeDtypeStruct((8, 128), jnp.float32),
            grid_spec=pltpu.PrefetchScalarGridSpec(
                num_scalar_prefetch=0,
                grid=(1,),
                in_specs=[
                    pl.BlockSpec((8, 128), lambda i: (0, 0)),
                    pl.BlockSpec((8, 128), lambda i: (0, 0),
                                 pipeline_mode=pl.Buffered(1)),
                ],
                out_specs=pl.BlockSpec((8, 128), lambda i: (0, 0)),
            ),
        )
        arg = jax.ShapeDtypeStruct((8, 128), jnp.float32)
        jax.jit(f).lower(arg, arg).compile()
        return True
    except Exception:
        return False


def _vmem_needed(tm, nx, tk, w_bufs):
    # bf16 W_fc/W_proj chunks + f32 bias chunks, times buffer count
    weights = w_bufs * (4 * nx * tk + 4 * (tk + nx))
    io = 2 * tm * nx * 4 + 2 * tm * nx * 4      # double-buffered f32 x / out tiles
    acc = tm * nx * 4                           # f32 accumulator scratch
    h = tm * tk * (4 + 2)                       # f32 h intermediate + bf16 copy for 2nd matmul
    return weights + io + acc + h


def _choose_tk(n_state, nx, tm, num_m, budget, w_single):
    divs = [d for d in (2048, 1024, 512, 256, 128)
            if d < n_state and n_state % d == 0]
    # Decode / small-M regime (grid collapses to one token tile): stream weight
    # chunks over the k axis so their DMA pipelines against compute instead of
    # being fully exposed before a single step.
    if num_m == 1 and divs:
        for d in divs:
            if n_state // d >= 4 and _vmem_needed(tm, nx, d, 2) <= budget:
                return d
        for d in divs:
            if _vmem_needed(tm, nx, d, 2) <= budget:
                return d
    # Weights fully resident when they fit (single-buffered if supported).
    if _vmem_needed(tm, nx, n_state, 1 if w_single else 2) <= budget:
        return n_state
    # Otherwise tile n_state (needed e.g. for large models on v7x's 64 MiB VMEM).
    for d in divs:
        if _vmem_needed(tm, nx, d, 2) <= budget:
            return d
    return divs[-1] if divs else n_state


def mlp_pallas(x, w_fc, b_fc, w_proj, b_proj, *, tm=512):
    """x: (B, T, nx). Weights ideally pre-converted to bf16 once by the caller.
    Returns (B, T, nx) in x.dtype. No host sync inside."""
    B, T, nx = x.shape
    n_state = w_fc.shape[1]
    M = B * T

    # bf16 MXU operands (f32 accumulation); biases stay f32.
    w1 = w_fc if w_fc.dtype == jnp.bfloat16 else w_fc.astype(jnp.bfloat16)
    w2 = w_proj if w_proj.dtype == jnp.bfloat16 else w_proj.astype(jnp.bfloat16)
    b1 = b_fc.reshape(1, n_state).astype(jnp.float32)
    b2 = b_proj.reshape(1, nx).astype(jnp.float32)
    # No pad, no cast: ragged last tile is masked by Pallas; x->bf16 is in-kernel.
    x2 = x.reshape(M, nx)

    vmem_cap = _vmem_capacity_bytes()
    budget = vmem_cap - 8 * 2 ** 20            # margin for Mosaic internals

    # Token tile: multiple of 16 (bf16 sublane packing), never larger than needed.
    tm_eff = min(_round_up(tm, 16), _round_up(M, 16))
    tk_floor = 128 if n_state % 128 == 0 else n_state
    while tm_eff > 16 and _vmem_needed(tm_eff, nx, tk_floor, 2) > budget:
        tm_eff = max(16, _round_up(tm_eff // 2, 16))
    num_m = pl.cdiv(M, tm_eff)

    w_single = _single_buffer_ok()
    tk = _choose_tk(n_state, nx, tm_eff, num_m, budget, w_single)
    num_k = n_state // tk
    resident = (num_k == 1)
    w_bufs = 1 if (resident and w_single) else 2

    def _wspec(shape, index_map):
        # Resident weights: constant block -> single buffer halves weight VMEM.
        if resident and w_single:
            return pl.BlockSpec(shape, index_map, pipeline_mode=pl.Buffered(1))
        return pl.BlockSpec(shape, index_map)

    needed = _vmem_needed(tm_eff, nx, tk, w_bufs)
    vmem_limit = int(min(vmem_cap - 4 * 2 ** 20,
                         max(needed + needed // 4 + (2 << 20), 32 * 2 ** 20)))

    itemsize = jnp.dtype(x.dtype).itemsize
    weight_passes = 1 if resident else num_m
    cost = pl.CostEstimate(
        flops=4 * M * nx * n_state,                 # two matmuls
        transcendentals=M * n_state,                # tanh in gelu
        bytes_accessed=int(M * nx * itemsize * 2
                           + weight_passes * (w1.size * 2 + w2.size * 2)
                           + b1.size * 4 + b2.size * 4),
    )

    out = pl.pallas_call(
        mlp_kernel,
        out_shape=jax.ShapeDtypeStruct((M, nx), x.dtype),
        grid_spec=pltpu.PrefetchScalarGridSpec(
            num_scalar_prefetch=0,
            grid=(num_m, num_k),
            in_specs=[
                pl.BlockSpec((tm_eff, nx), lambda i, k: (i, 0)),   # x tile
                _wspec((nx, tk), lambda i, k: (0, k)),             # W_fc chunk
                _wspec((1, tk), lambda i, k: (0, k)),              # b_fc chunk
                _wspec((tk, nx), lambda i, k: (k, 0)),             # W_proj chunk
                _wspec((1, nx), lambda i, k: (0, 0)),              # b_proj
            ],
            out_specs=pl.BlockSpec((tm_eff, nx), lambda i, k: (i, 0)),
            scratch_shapes=[pltpu.VMEM((tm_eff, nx), jnp.float32)],
        ),
        compiler_params=pltpu.CompilerParams(
            dimension_semantics=("parallel", "arbitrary"),
            vmem_limit_bytes=vmem_limit,
        ),
        cost_estimate=cost,
    )(x2, w1, b1, w2, b2)

    return out.reshape(B, T, nx)


def mlp_reference(x, w_fc, b_fc, w_proj, b_proj):
    B, T, nx = x.shape
    h = _gelu_tanh(x.reshape(-1, nx) @ w_fc + b_fc)
    out = h @ w_proj + b_proj
    return out.reshape(B, T, nx)


if __name__ == "__main__":
    # cfg.n_embd = 32, n_state = 4 * n_embd = 128, afn = 'gelu'
    batch, seq, n_embd = 2, 8, 32
    n_state = 4 * n_embd

    key = jax.random.PRNGKey(0)
    kx, kw1, kw2 = jax.random.split(key, 3)

    x = jax.random.normal(kx, (batch, seq, n_embd), dtype=jnp.float32)
    # Conv1D init: normal(std=0.02) weights, zero biases (f32 master params).
    w_fc = 0.02 * jax.random.normal(kw1, (n_embd, n_state), dtype=jnp.float32)
    b_fc = jnp.zeros((n_state,), dtype=jnp.float32)
    w_proj = 0.02 * jax.random.normal(kw2, (n_state, n_embd), dtype=jnp.float32)
    b_proj = jnp.zeros((n_embd,), dtype=jnp.float32)

    # Convert weights to bf16 once, outside the per-call hot path.
    w_fc_bf16 = w_fc.astype(jnp.bfloat16)
    w_proj_bf16 = w_proj.astype(jnp.bfloat16)

    out = mlp_pallas(x, w_fc_bf16, b_fc, w_proj_bf16, b_proj)
    out = jax.block_until_ready(out)

    ref = mlp_reference(x, w_fc, b_fc, w_proj, b_proj)
    assert out.shape == (batch, seq, n_embd)
    # bf16 matmul inputs (f32 accumulation) -> slightly looser tolerance than pure f32.
    assert bool(jnp.allclose(out, ref, atol=5e-3, rtol=5e-2)), "mismatch vs reference"

    print("KERNEL_OK")
</pallas_src>

<mosaic_0001>
module attributes {stable_mosaic.version = 11 : i64} {
  func.func @mlp_kernel(%arg0: i32, %arg1: i32, %arg2: memref<16x32xf32, #tpu.memory_space<vmem>>, %arg3: memref<32x128xbf16, #tpu.memory_space<vmem>>, %arg4: memref<1x128xf32, #tpu.memory_space<vmem>>, %arg5: memref<128x32xbf16, #tpu.memory_space<vmem>>, %arg6: memref<1x32xf32, #tpu.memory_space<vmem>>, %arg7: memref<16x32xf32, #tpu.memory_space<vmem>>, %arg8: memref<16x32xf32, #tpu.memory_space<vmem>>) attributes {dimension_semantics = [#tpu.dimension_semantics<parallel>, #tpu.dimension_semantics<arbitrary>], iteration_bounds = array<i64: 1, 1>, scalar_prefetch = 0 : i64, scratch_operands = 1 : i64, tpu.core_type = #tpu.core_type<tc>, window_params = [{transform_indices = @transform_0, window_bounds = array<i64: 16, 32>}, {transform_indices = @transform_1, window_bounds = array<i64: 32, 128>}, {transform_indices = @transform_2, window_bounds = array<i64: 1, 128>}, {transform_indices = @transform_3, window_bounds = array<i64: 128, 32>}, {pipeline_mode = #tpu.pipeline_mode<synchronous>, transform_indices = @transform_4, window_bounds = array<i64: 1, 32>}, {transform_indices = @transform_5, window_bounds = array<i64: 16, 32>}]} {
    %c0_i32 = arith.constant 0 : i32
    %0 = arith.cmpi eq, %arg1, %c0_i32 : i32
    %1 = arith.extui %0 : i1 to i32
    %c0_i32_0 = arith.constant 0 : i32
    %2 = arith.cmpi ne, %1, %c0_i32_0 : i32
    scf.if %2 {
      %cst_19 = arith.constant 0.000000e+00 : f32
      %32 = vector.broadcast %cst_19 : f32 to vector<16x32xf32>
      %c0_20 = arith.constant 0 : index
      %c0_21 = arith.constant 0 : index
      %33 = vector.load %arg8[%c0_20, %c0_21] : memref<16x32xf32, #tpu.memory_space<vmem>>, vector<16x32xf32>
      tpu.vector_store %arg8[%c0_20, %c0_21], %32 {strides = array<i32>} : memref<16x32xf32, #tpu.memory_space<vmem>>, vector<16x32xf32>,
    } else {
    }
    %c0 = arith.constant 0 : index
    %c0_1 = arith.constant 0 : index
    %3 = vector.load %arg2[%c0, %c0_1] : memref<16x32xf32, #tpu.memory_space<vmem>>, vector<16x32xf32>
    %4 = arith.truncf %3 : vector<16x32xf32> to vector<16x32xbf16>
    %c0_2 = arith.constant 0 : index
    %c0_3 = arith.constant 0 : index
    %5 = vector.load %arg3[%c0_2, %c0_3] : memref<32x128xbf16, #tpu.memory_space<vmem>>, vector<32x128xbf16>
    %cst = arith.constant dense<0.000000e+00> : vector<16x128xf32>
    %6 = tpu.matmul %4, %5, %cst {dimension_numbers = #tpu.dot_dimension_numbers<[1], [0], [0], [1], [0, 0, 1, 1], [], []>} : vector<16x32xbf16>, vector<32x128xbf16>, vector<16x128xf32> -> vector<16x128xf32>
    %c0_4 = arith.constant 0 : index
    %c0_5 = arith.constant 0 : index
    %7 = vector.load %arg4[%c0_4, %c0_5] : memref<1x128xf32, #tpu.memory_space<vmem>>, vector<1x128xf32>
    %8 = vector.broadcast %7 : vector<1x128xf32> to vector<16x128xf32>
    %9 = arith.addf %6, %8 : vector<16x128xf32>
    %cst_6 = arith.constant 5.000000e-01 : f32
    %10 = vector.broadcast %cst_6 : f32 to vector<16x128xf32>
    %11 = arith.mulf %10, %9 : vector<16x128xf32>
    %12 = arith.mulf %9, %9 : vector<16x128xf32>
    %13 = arith.mulf %12, %9 : vector<16x128xf32>
    %cst_7 = arith.constant 4.471500e-02 : f32
    %14 = vector.broadcast %cst_7 : f32 to vector<16x128xf32>
    %15 = arith.mulf %14, %13 : vector<16x128xf32>
    %16 = arith.addf %9, %15 : vector<16x128xf32>
    %cst_8 = arith.constant 0.797884583 : f32
    %17 = vector.broadcast %cst_8 : f32 to vector<16x128xf32>
    %18 = arith.mulf %17, %16 : vector<16x128xf32>
    %19 = math.tanh %18 : vector<16x128xf32>
    %cst_9 = arith.constant 1.000000e+00 : f32
    %20 = vector.broadcast %cst_9 : f32 to vector<16x128xf32>
    %21 = arith.addf %20, %19 : vector<16x128xf32>
    %22 = arith.mulf %11, %21 : vector<16x128xf32>
    %c0_10 = arith.constant 0 : index
    %c0_11 = arith.constant 0 : index
    %23 = vector.load %arg8[%c0_10, %c0_11] : memref<16x32xf32, #tpu.memory_space<vmem>>, vector<16x32xf32>
    %24 = arith.truncf %22 : vector<16x128xf32> to vector<16x128xbf16>
    %c0_12 = arith.constant 0 : index
    %c0_13 = arith.constant 0 : index
    %25 = vector.load %arg5[%c0_12, %c0_13] : memref<128x32xbf16, #tpu.memory_space<vmem>>, vector<128x32xbf16>
    %cst_14 = arith.constant dense<0.000000e+00> : vector<16x32xf32>
    %26 = tpu.matmul %24, %25, %cst_14 {dimension_numbers = #tpu.dot_dimension_numbers<[1], [0], [0], [1], [0, 0, 1, 1], [], []>} : vector<16x128xbf16>, vector<128x32xbf16>, vector<16x32xf32> -> vector<16x32xf32>
    %27 = arith.addf %23, %26 : vector<16x32xf32>
    %c0_15 = arith.constant 0 : index
    %c0_16 = arith.constant 0 : index
    %28 = vector.load %arg8[%c0_15, %c0_16] : memref<16x32xf32, #tpu.memory_space<vmem>>, vector<16x32xf32>
    tpu.vector_store %arg8[%c0_15, %c0_16], %27 {strides = array<i32>} : memref<16x32xf32, #tpu.memory_space<vmem>>, vector<16x32xf32>,
    %c0_i32_17 = arith.constant 0 : i32
    %29 = arith.cmpi eq, %arg1, %c0_i32_17 : i32
    %30 = arith.extui %29 : i1 to i32
    %c0_i32_18 = arith.constant 0 : i32
    %31 = arith.cmpi ne, %30, %c0_i32_18 : i32
    scf.if %31 {
      %c0_19 = arith.constant 0 : index
      %c0_20 = arith.constant 0 : index
      %32 = vector.load %arg8[%c0_19, %c0_20] : memref<16x32xf32, #tpu.memory_space<vmem>>, vector<16x32xf32>
      %c0_21 = arith.constant 0 : index
      %c0_22 = arith.constant 0 : index
      %33 = vector.load %arg6[%c0_21, %c0_22] : memref<1x32xf32, #tpu.memory_space<vmem>>, vector<1x32xf32>
      %34 = vector.broadcast %33 : vector<1x32xf32> to vector<16x32xf32>
      %35 = arith.addf %32, %34 : vector<16x32xf32>
      %c0_23 = arith.constant 0 : index
      %c0_24 = arith.constant 0 : index
      %36 = vector.load %arg7[%c0_23, %c0_24] : memref<16x32xf32, #tpu.memory_space<vmem>>, vector<16x32xf32>
      tpu.vector_store %arg7[%c0_23, %c0_24], %35 {strides = array<i32>} : memref<16x32xf32, #tpu.memory_space<vmem>>, vector<16x32xf32>,
    } else {
    }
    return
  }
  func.func @transform_0(%arg0: i32, %arg1: i32) -> (i32, i32) {
    %c0_i32 = arith.constant 0 : i32
    %c0_i32_0 = arith.constant 0 : i32
    return %arg0, %c0_i32 : i32, i32
  }
  func.func @transform_1(%arg0: i32, %arg1: i32) -> (i32, i32) {
    %c0_i32 = arith.constant 0 : i32
    %c0_i32_0 = arith.constant 0 : i32
    return %c0_i32, %arg1 : i32, i32
  }
  func.func @transform_2(%arg0: i32, %arg1: i32) -> (i32, i32) {
    %c0_i32 = arith.constant 0 : i32
    %c0_i32_0 = arith.constant 0 : i32
    return %c0_i32, %arg1 : i32, i32
  }
  func.func @transform_3(%arg0: i32, %arg1: i32) -> (i32, i32) {
    %c0_i32 = arith.constant 0 : i32
    %c0_i32_0 = arith.constant 0 : i32
    return %arg1, %c0_i32 : i32, i32
  }
  func.func @transform_4(%arg0: i32, %arg1: i32) -> (i32, i32) {
    %c0_i32 = arith.constant 0 : i32
    %c0_i32_0 = arith.constant 0 : i32
    %c0_i32_1 = arith.constant 0 : i32
    return %c0_i32, %c0_i32_0 : i32, i32
  }
  func.func @transform_5(%arg0: i32, %arg1: i32) -> (i32, i32) {
    %c0_i32 = arith.constant 0 : i32
    %c0_i32_0 = arith.constant 0 : i32
    return %arg0, %c0_i32 : i32, i32
  }
}

</mosaic_0001>

<bundles_post_ra>
// kernel: tpu_custom_call.1
= control target key start
LH: loop header
LB: loop body
LE: loop exit
PB: predicated region body
PF: predicated region fallthrough
CT: control target
= control target key end

     0   :  { %v358_v1 = vmov 0.0   ;;  %vm359_vm0 = vmmov 0   ;;  %vm26_vm1 = vcmask 261120   ;;  %s454_s0 = inlined_call_operand.vmem [shape: f32[16,32], index: 0, kind: input, shape index: {}]   ;;  %s455_s1 = inlined_call_operand.vmem [shape: bf16[32,128], index: 1, kind: input, shape index: {}]   ;;  %s456_s2 = inlined_call_operand.vmem [shape: f32[1,128], index: 2, kind: input, shape index: {}]   ;;  %s457_s3 = inlined_call_operand.vmem [shape: bf16[128,32], index: 3, kind: input, shape index: {}]   ;;  %s458_s4 = inlined_call_operand.vmem [shape: f32[1,32], index: 4, kind: input, shape index: {}]   ;;  %s459_s5 = inlined_call_operand.hbm [shape: f32[16,32], index: 5, kind: output, shape index: {}]  }
   0x1   :  { %v320_v0 = vld [vmem:[%s455_s1] sm:$0xff]   ;;  %287 = vmatprep.subr.bf16.mxu0 %v358_v1  ;;  %295 = vmatprep.subr.bf16.mxu1 %v358_v1  ;;  %v321_v2 = vld [vmem:[%s455_s1 + $0x8] sm:$0xff]   ;;  %27 = vst.msk [vmem:[#allocation2] sm:$0xff] %vm26_vm1, %v358_v1  ;;  %28 = vst.msk [vmem:[#allocation2 + $0x8] sm:$0xff] %vm26_vm1, %v358_v1 }
   0x2   :  { %288 = vmatpush3.bf16.msra.mxu0 %v320_v0  ;;  %291 = vmatprep.mubr.msk.bf16.mxu0 %vm359_vm0, %v358_v1  ;;  %v29_v3 = vld [vmem:[%s454_s0] sm:$0xff]  ;;  %v30_v4 = vld [vmem:[%s454_s0 + $0x8] sm:$0xff] }
   0x3   :  { %289 = vmatprep.subr.bf16.mxu0 %v358_v1  ;;  %311 = vmatprep.mubr.msk.bf16.mxu1 %vm359_vm0, %v358_v1  ;;  %v31_v5 = vpack.c.bf16 %v30_v4, %v29_v3 }
   0x6   :  { %290 = vmatpush3.bf16.msra.mxu0 %v321_v2 }
   0x7   :  { %10 = vsyncpa [#allocation4], 0  ;;  %v322_v6 = vld [vmem:[%s457_s3] sm:$0xff]   ;;  %v323_v7 = vld [vmem:[%s457_s3 + $0x8] sm:$0xff]   ;;  %s360_s17 = smov [#allocation3]  }
   0x8   :  { %296 = vmatpush3.bf16.msra.mxu1 %v322_v6  ;;  %v324_v8 = vld [vmem:[%s457_s3 + $0x10] sm:$0xff]   ;;  %v325_v9 = vld [vmem:[%s457_s3 + $0x18] sm:$0xff]   ;;  %v326_v10 = vld [vmem:[%s457_s3 + $0x20] sm:$0xff]   ;;  %s251_s18 = sshll.u32 %s360_s17, 4  ;;  %s252_s18 = int_to_ptr.vmem [resolvable:$true] %s251_s18 }
   0x9   :  { %292 = vmatmul.mubr.msk.bf16.vlgmr.msra.gmra.mrb[0].mxu0 %vm26_vm1, %v31_v5  ;;  %297 = vmatprep.subr.bf16.mxu1 %v358_v1  ;;  %v327_v11 = vld [vmem:[%s457_s3 + $0x28] sm:$0xff]   ;;  %v328_v12 = vld [vmem:[%s457_s3 + $0x30] sm:$0xff]   ;;  %v329_v13 = vld [vmem:[%s457_s3 + $0x38] sm:$0xff]   ;;  %s334_s19 = scalar_lea.vmem %s252_s18, 256  ;;  %p339_p1 = scmp.lt.s32.totalorder %s252_s18, %s252_s18 }
   0xa   :  { %v262_v14 = vld [vmem:[%s456_s2] ss:$0 sm:$0xff]  ;;  %v119_v42 = vld [vmem:[#allocation2 + $0x8] sm:$0xff]  ;;  %p335_p0 = scmp.ne.s32.totalorder %s252_s18, %s334_s19  ;;  %p340_p2 = scmp.lt.s32.totalorder %s334_s19, %s334_s19 }
   0xb   :  { %v118_v40 = vld [vmem:[#allocation2] sm:$0xff] }
   0xc   :  { %298 = vmatpush3.bf16.msra.mxu1 %v323_v7  ;;  %v274_v48 = vld [vmem:[%s458_s4] ss:$0 sm:$0xff]  ;;  %p341_p3 = por %p340_p2, %p339_p1 }
   0xd   :  { %299 = vmatprep.subr.bf16.mxu1 %v358_v1 }
   0xe   :  { %p342_p4 = pnand %p341_p3, %p335_p0 }
  0x10   :  { %300 = vmatpush3.bf16.msra.mxu1 %v324_v8 }
  0x11   :  { %301 = vmatprep.subr.bf16.mxu1 %v358_v1 }
  0x14   :  { %302 = vmatpush3.bf16.msra.mxu1 %v325_v9 }
  0x15   :  { %303 = vmatprep.subr.bf16.mxu1 %v358_v1 }
  0x18   :  { %304 = vmatpush3.bf16.msra.mxu1 %v326_v10 }
  0x19   :  { %305 = vmatprep.subr.bf16.mxu1 %v358_v1 }
  0x1c   :  { %306 = vmatpush3.bf16.msra.mxu1 %v327_v11 }
  0x1d   :  { %307 = vmatprep.subr.bf16.mxu1 %v358_v1 }
  0x20   :  { %308 = vmatpush3.bf16.msra.mxu1 %v328_v12 }
  0x21   :  { %309 = vmatprep.subr.bf16.mxu1 %v358_v1 }
  0x24   :  { %310 = vmatpush3.bf16.msra.mxu1 %v329_v13 }
  0xdc   :  { %v93_v15 = vpop.f32.mrb[0].mxu0 }
  0xdd   :  { %v94_v16 = vadd.f32 %v262_v14, %v93_v15  ;;  %v293_v17 = vpop.f32.mrb[1].mxu0 }
  0xde   :  { %v96_v18 = vpop.f32.mrb[2].mxu0 }
  0xdf   :  { %v102_v19 = vmul.f32 %v94_v16, %v94_v16  ;;  %v97_v20 = vadd.f32 %v262_v14, %v96_v18  ;;  %v294_v21 = vpop.f32.mrb[3].mxu0  ;;  %v100_v34 = vmul.f32 0.5, %v94_v16 }
  0xe1   :  { %v104_v22 = vmul.f32 %v102_v19, %v94_v16  ;;  %v103_v23 = vmul.f32 %v97_v20, %v97_v20  ;;  %v101_v35 = vmul.f32 0.5, %v97_v20 }
  0xe3   :  { %v106_v24 = vmul.f32 0.044715, %v104_v22  ;;  %v105_v25 = vmul.f32 %v103_v23, %v97_v20 }
  0xe5   :  { %v108_v26 = vadd.f32 %v106_v24, %v94_v16  ;;  %v107_v27 = vmul.f32 0.044715, %v105_v25 }
  0xe7   :  { %v110_v28 = vmul.f32 0.7978846, %v108_v26  ;;  %v109_v29 = vadd.f32 %v107_v27, %v97_v20 }
  0xe9   :  { %330 = vtanh.f32 %v110_v28  ;;  %v111_v30 = vmul.f32 0.7978846, %v109_v29 }
  0xeb   :  { %332 = vtanh.f32 %v111_v30 }
  0xf3   :  { %v331_v31 = vpop.eup %330 }
  0xf4   :  { %v114_v32 = vadd.f32 1.0, %v331_v31 }
  0xf5   :  { %v333_v33 = vpop.eup %332 }
  0xf6   :  { %v115_v36 = vadd.f32 1.0, %v333_v33  ;;  %v116_v37 = vmul.f32 %v114_v32, %v100_v34 }
  0xf8   :  { %v117_v38 = vmul.f32 %v115_v36, %v101_v35 }
  0xfa   :  { %v120_v39 = vpack.c.bf16 %v117_v38, %v116_v37 }
  0xfc   :  { %312 = vmatmul.mubr.bf16.vlgmr.msra.gmra.mrb[0].mxu1 %v120_v39 }
 0x1cf   :  { %v219_v41 = vpop.f32.mrb[0].mxu1 }
 0x1d0   :  { %v226_v43 = vadd.f32 %v219_v41, %v118_v40  ;;  %v313_v44 = vpop.f32.mrb[1].mxu1 }
 0x1d1   :  { %v222_v45 = vpop.f32.mrb[2].mxu1 }
 0x1d2   :  { %228 = vst.msk [vmem:[#allocation2] sm:$0xff] %vm26_vm1, %v226_v43  ;;  %v227_v46 = vadd.f32 %v222_v45, %v119_v42  ;;  %v314_v47 = vpop.f32.mrb[3].mxu1 }
 0x1d4   :  { %229 = vst.msk [vmem:[#allocation2 + $0x8] sm:$0xff] %vm26_vm1, %v227_v46 }
 0x1d9   :  { %v233_v49 = vld [vmem:[#allocation2] sm:$0xff] }
 0x1da   :  { %v242_v50 = vadd.f32 %v274_v48, %v233_v49 }
 0x1db   :  { %v234_v51 = vld [vmem:[#allocation2 + $0x8] sm:$0xff] }
 0x1dc   :  { %v243_v52 = vadd.f32 %v274_v48, %v234_v51  ;;  %244 = vst.msk [vmem:[#allocation3] sm:$0xff] %vm26_vm1, %v242_v50 }
 0x1de   :  { %245 = vst.msk [vmem:[#allocation3 + $0x8] sm:$0xff] %vm26_vm1, %v243_v52 }
 0x1df   :  { %345 = shalt.err (!%p342_p4)
}
 0x1e0   :  { %s346_s21 = scalar_lea.hbm %s459_s5, 256 }
 0x1e1   :  { %p347_p5 = scmp.ne.s32.totalorder %s459_s5, %s346_s21  ;;  %p350_p6 = scmp.lt.u32.totalorder %s346_s21, %s459_s5 }
 0x1e3   :  { %p352_p7 = pnand %p350_p6, %p347_p5 }
 0x1e5   :  { %355 = shalt.err (!%p352_p7)
}
 0x1e6   :  { %s361_s1 = smov 128   ;;  %s362_s26 = smov 8  }
 0x1e7   :  { %257 = dma.vmem_to_hbm [thread:$0]  %s252_s18, 256, %s459_s5, [#allocation4], %s361_s1, %s361_s1, %s362_s26  }
 0x1e8   :  { %356 = dma.done.wait [#allocation4], 256  }
 0x1e9   :  { %357 = vsyncadd [#allocation4], 4294967040 }
 0x1ea   :  { %261 = vsyncpa [#allocation4], 1 }

</bundles_post_ra>
